<compile_context>
chip_gen: v5e
topology: v5e:2x2
jax: 0.10.0
libtpu: 0.0.40
codegen_flags: <defaults>
</compile_context>

<pallas_src>
import math

import jax
import jax.numpy as jnp
from jax.experimental import pallas as pl
from jax.experimental.pallas import tpu as pltpu

INPUT_DIM = 16
HIDDEN_DIM = 32
OUTPUT_DIM = 8
NUM_HEADS = 4
HEAD_DIM = HIDDEN_DIM // NUM_HEADS
LN_EPS = 1e-5
LANE = 128  # column padding of packed weight blocks (lane-tile width)

# Vector-slab row indices (one bias / LayerNorm vector per 128-lane row).
R_B_EMBED, R_G_EMBED, R_BE_EMBED = 0, 1, 2
R_B_INPROJ = 3
R_B_OUTPROJ = 4
R_PROC0 = 5          # rows 5..13: (bias, gamma, beta) x 3 processing layers
R_B_O1 = 14
R_B_O2 = 15
N_VEC_ROWS = 16

# Weight-slab-A block indices (in_features == HIDDEN_DIM, 128-lane blocks).
WA_INPROJ, WA_OUTPROJ, WA_P0, WA_P1, WA_P2, WA_O1 = 0, 1, 2, 3, 4, 5
# Weight-slab-B block indices (in_features == 16).
WB_EMBED, WB_O2 = 0, 1


def _layernorm(x, gamma, beta):
    mean = jnp.mean(x, axis=-1, keepdims=True)
    var = jnp.mean(jnp.square(x - mean), axis=-1, keepdims=True)
    return (x - mean) * jax.lax.rsqrt(var + LN_EPS) * gamma + beta


def attention_qnet_kernel(x_ref, wa_ref, wb_ref, vec_ref, out_ref):
    H = HIDDEN_DIM

    def wa(block, width):                      # (32, width), lane-aligned start
        lo = block * LANE
        return wa_ref[:, lo:lo + width]

    def wb(block, width):                      # (16, width), lane-aligned start
        lo = block * LANE
        return wb_ref[:, lo:lo + width]

    def vec(row, width):                       # (1, width), lane-0 aligned
        return vec_ref[row:row + 1, 0:width]

    x = x_ref[...].astype(jnp.float32)

    # ---- feature_embed: Linear -> LayerNorm -> ReLU -> (Dropout = id) ----
    e = jnp.dot(x, wb(WB_EMBED, H), preferred_element_type=jnp.float32) + vec(R_B_EMBED, H)
    e = _layernorm(e, vec(R_G_EMBED, H), vec(R_BE_EMBED, H))
    e = jnp.maximum(e, 0.0)

    # ---- MultiheadAttention(e, e, e): sequence axis == batch axis (unbatched) ----
    qkv = jnp.dot(e, wa(WA_INPROJ, 3 * H), preferred_element_type=jnp.float32) \
        + vec(R_B_INPROJ, 3 * H)
    w_out = wa(WA_OUTPROJ, H)                  # (H, H) = (in, out)
    scale = 1.0 / math.sqrt(HEAD_DIM)

    attended = None
    for h in range(NUM_HEADS):                 # static unroll, out-proj fused per head
        lo = h * HEAD_DIM
        qh = qkv[:, lo:lo + HEAD_DIM]
        kh = qkv[:, H + lo:H + lo + HEAD_DIM]
        vh = qkv[:, 2 * H + lo:2 * H + lo + HEAD_DIM]
        s = jax.lax.dot_general(qh, kh, (((1,), (1,)), ((), ())),
                                preferred_element_type=jnp.float32) * scale
        s = s - jnp.max(s, axis=-1, keepdims=True)
        p = jnp.exp(s)
        p = p * pl.reciprocal(jnp.sum(p, axis=-1, keepdims=True), approx=True)
        o_h = jnp.dot(p, vh, preferred_element_type=jnp.float32)          # (B, HEAD_DIM)
        contrib = jnp.dot(o_h, w_out[lo:lo + HEAD_DIM, :],                # (B, H)
                          preferred_element_type=jnp.float32)
        attended = contrib if attended is None else attended + contrib

    xp = e + attended + vec(R_B_OUTPROJ, H)

    # ---- 3 residual processing layers: Linear -> LN -> ReLU -> (Dropout) + res ----
    for i in range(3):
        r = R_PROC0 + 3 * i
        h_lin = jnp.dot(xp, wa(WA_P0 + i, H), preferred_element_type=jnp.float32) \
            + vec(r, H)
        h_lin = _layernorm(h_lin, vec(r + 1, H), vec(r + 2, H))
        xp = jnp.maximum(h_lin, 0.0) + xp

    # ---- output head: Linear -> ReLU -> (Dropout) -> Linear ----
    h1 = jnp.dot(xp, wa(WA_O1, H // 2), preferred_element_type=jnp.float32) \
        + vec(R_B_O1, H // 2)
    h1 = jnp.maximum(h1, 0.0)
    out = jnp.dot(h1, wb(WB_O2, OUTPUT_DIM), preferred_element_type=jnp.float32) \
        + vec(R_B_O2, OUTPUT_DIM)
    out_ref[...] = out.astype(out_ref.dtype)


# ----------------------------------------------------------------------------- #
# Parameter construction / packing
# ----------------------------------------------------------------------------- #
def xavier_uniform(key, out_f, in_f):
    a = math.sqrt(6.0 / (in_f + out_f))
    return jax.random.uniform(key, (out_f, in_f), jnp.float32, minval=-a, maxval=a)


def init_params(key):
    """PyTorch-layout parameters: Linear weights (out, in); vectors as (1, n)."""
    ks = jax.random.split(key, 16)
    H, I, O = HIDDEN_DIM, INPUT_DIM, OUTPUT_DIM
    row = lambda n, v: jnp.full((1, n), v, jnp.float32)
    params = [
        xavier_uniform(ks[0], H, I), row(H, 0.0), row(H, 1.0), row(H, 0.0),   # feature_embed
        xavier_uniform(ks[1], 3 * H, H), row(3 * H, 0.0),                     # attn in_proj
        xavier_uniform(ks[2], H, H), row(H, 0.0),                             # attn out_proj
    ]
    for i in range(3):                                                        # processing layers
        params += [xavier_uniform(ks[3 + i], H, H), row(H, 0.0), row(H, 1.0), row(H, 0.0)]
    params += [
        xavier_uniform(ks[6], H // 2, H), row(H // 2, 0.0),                   # output layer 1
        xavier_uniform(ks[7], O, H // 2), row(O, 0.0),                        # output layer 2
    ]
    return params


def pack_params(params):
    """Pre-transpose weights to (in, out) and pack everything into 3 slabs."""
    (w_e, b_e, g_e, be_e, w_in, b_in, w_out, b_out,
     w0, b0, g0, bt0, w1, b1, g1, bt1, w2, b2, g2, bt2,
     wo1, bo1, wo2, bo2) = params

    def pad_block(w):                      # w: PyTorch (out, in) -> (in, LANE)
        wt = w.T
        return jnp.pad(wt, ((0, 0), (0, LANE - wt.shape[1])))

    wa = jnp.concatenate([pad_block(w) for w in (w_in, w_out, w0, w1, w2, wo1)], axis=1)
    wb = jnp.concatenate([pad_block(w) for w in (w_e, wo2)], axis=1)

    vecs = [b_e, g_e, be_e, b_in, b_out,
            b0, g0, bt0, b1, g1, bt1, b2, g2, bt2, bo1, bo2]
    vec = jnp.concatenate(
        [jnp.pad(v, ((0, 0), (0, LANE - v.shape[1]))) for v in vecs], axis=0)
    assert vec.shape == (N_VEC_ROWS, LANE)
    return wa, wb, vec


# ----------------------------------------------------------------------------- #
# Wrapper
# ----------------------------------------------------------------------------- #
def attention_qnetwork_forward(x, packed):
    squeeze_out = False
    if x.ndim == 1:
        x = x[None, :]
    if x.shape[0] == 1:
        squeeze_out = True
    B = x.shape[0]
    wa, wb, vec = packed

    H = HIDDEN_DIM
    matmul_flops = 2 * B * (INPUT_DIM * H + H * 3 * H + H * H + 3 * H * H
                            + H * (H // 2) + (H // 2) * OUTPUT_DIM) \
        + 2 * NUM_HEADS * 2 * B * B * HEAD_DIM
    cost = pl.CostEstimate(
        flops=int(matmul_flops),
        transcendentals=int(NUM_HEADS * B * B + 8 * B),
        bytes_accessed=int(4 * (x.size + wa.size + wb.size + vec.size + B * OUTPUT_DIM)),
    )

    vmem = pl.BlockSpec(memory_space=pltpu.MemorySpace.VMEM)
    out = pl.pallas_call(
        attention_qnet_kernel,
        out_shape=jax.ShapeDtypeStruct((B, OUTPUT_DIM), jnp.float32),
        in_specs=[vmem] * 4,
        out_specs=vmem,
        cost_estimate=cost,
    )(x, wa, wb, vec)
    # TODO(synk): for large B, switch to a (features, batch) lane-dense layout with a
    # parallel batch grid + flash-style attention blocking (items 5-7 of the perf review).
    if squeeze_out:
        out = out[0]
    return out


# ----------------------------------------------------------------------------- #
# Pure-JAX reference (mirrors the PyTorch forward in eval mode)
# ----------------------------------------------------------------------------- #
def reference_forward(x, params):
    if x.ndim == 1:
        x = x[None, :]
    (w_e, b_e, g_e, be_e, w_in, b_in, w_out, b_out,
     w0, b0, g0, bt0, w1, b1, g1, bt1, w2, b2, g2, bt2,
     wo1, bo1, wo2, bo2) = params
    e = jnp.maximum(_layernorm(x @ w_e.T + b_e, g_e, be_e), 0.0)
    qkv = e @ w_in.T + b_in
    q, k, v = jnp.split(qkv, 3, axis=-1)
    B = e.shape[0]
    qh = q.reshape(B, NUM_HEADS, HEAD_DIM).transpose(1, 0, 2)
    kh = k.reshape(B, NUM_HEADS, HEAD_DIM).transpose(1, 0, 2)
    vh = v.reshape(B, NUM_HEADS, HEAD_DIM).transpose(1, 0, 2)
    s = jnp.einsum("hqd,hkd->hqk", qh, kh) / math.sqrt(HEAD_DIM)
    p = jax.nn.softmax(s, axis=-1)
    o = jnp.einsum("hqk,hkd->hqd", p, vh).transpose(1, 0, 2).reshape(B, HIDDEN_DIM)
    attended = o @ w_out.T + b_out
    xp = e + attended
    for (w, b, g, bt) in ((w0, b0, g0, bt0), (w1, b1, g1, bt1), (w2, b2, g2, bt2)):
        xp = jnp.maximum(_layernorm(xp @ w.T + b, g, bt), 0.0) + xp
    h1 = jnp.maximum(xp @ wo1.T + bo1, 0.0)
    out = h1 @ wo2.T + bo2
    if out.shape[0] == 1:
        out = out[0]
    return out


if __name__ == "__main__":
    key = jax.random.PRNGKey(0)
    pkey, xkey = jax.random.split(key)
    params = init_params(pkey)
    packed = pack_params(params)

    B = 8
    x = jax.random.normal(xkey, (B, INPUT_DIM), jnp.float32)

    out = attention_qnetwork_forward(x, packed)
    out = jax.block_until_ready(out)

    ref = reference_forward(x, params)
    assert out.shape == (B, OUTPUT_DIM), out.shape
    # approx reciprocal in the softmax introduces ~1e-4-level differences
    assert jnp.allclose(out, ref, atol=1e-3, rtol=1e-3), (out, ref)
    print("KERNEL_OK")
</pallas_src>

<mosaic_0001>
module attributes {stable_mosaic.version = 11 : i64} {
  func.func @attention_qnet_kernel(%arg0: memref<8x16xf32, #tpu.memory_space<vmem>>, %arg1: memref<32x768xf32, #tpu.memory_space<vmem>>, %arg2: memref<16x256xf32, #tpu.memory_space<vmem>>, %arg3: memref<16x128xf32, #tpu.memory_space<vmem>>, %arg4: memref<8x8xf32, #tpu.memory_space<vmem>>) attributes {dimension_semantics = [], scalar_prefetch = 0 : i64, scratch_operands = 0 : i64, tpu.core_type = #tpu.core_type<tc>} {
    %c0 = arith.constant 0 : index
    %c0_0 = arith.constant 0 : index
    %0 = vector.load %arg0[%c0, %c0_0] : memref<8x16xf32, #tpu.memory_space<vmem>>, vector<8x16xf32>
    %c0_1 = arith.constant 0 : index
    %c0_2 = arith.constant 0 : index
    %1 = vector.load %arg2[%c0_1, %c0_2] : memref<16x256xf32, #tpu.memory_space<vmem>>, vector<16x32xf32>
    %cst = arith.constant dense<0.000000e+00> : vector<8x32xf32>
    %2 = tpu.matmul %0, %1, %cst {dimension_numbers = #tpu.dot_dimension_numbers<[1], [0], [0], [1], [0, 0, 1, 1], [], []>} : vector<8x16xf32>, vector<16x32xf32>, vector<8x32xf32> -> vector<8x32xf32>
    %c0_3 = arith.constant 0 : index
    %c0_4 = arith.constant 0 : index
    %3 = vector.load %arg3[%c0_3, %c0_4] : memref<16x128xf32, #tpu.memory_space<vmem>>, vector<1x32xf32>
    %4 = vector.broadcast %3 : vector<1x32xf32> to vector<8x32xf32>
    %5 = arith.addf %2, %4 : vector<8x32xf32>
    %c1 = arith.constant 1 : index
    %c0_5 = arith.constant 0 : index
    %6 = vector.load %arg3[%c1, %c0_5] : memref<16x128xf32, #tpu.memory_space<vmem>>, vector<1x32xf32>
    %c2 = arith.constant 2 : index
    %c0_6 = arith.constant 0 : index
    %7 = vector.load %arg3[%c2, %c0_6] : memref<16x128xf32, #tpu.memory_space<vmem>>, vector<1x32xf32>
    %cst_7 = arith.constant dense<0.000000e+00> : vector<8xf32>
    %8 = vector.multi_reduction <add>, %5, %cst_7 [1] : vector<8x32xf32> to vector<8xf32>
    %9 = vector.shape_cast %8 : vector<8xf32> to vector<8x1xf32>
    %cst_8 = arith.constant 3.200000e+01 : f32
    %10 = vector.broadcast %cst_8 : f32 to vector<8x1xf32>
    %11 = arith.divf %9, %10 : vector<8x1xf32>
    %12 = vector.broadcast %11 : vector<8x1xf32> to vector<8x32xf32>
    %13 = arith.subf %5, %12 : vector<8x32xf32>
    %14 = arith.mulf %13, %13 : vector<8x32xf32>
    %cst_9 = arith.constant dense<0.000000e+00> : vector<8xf32>
    %15 = vector.multi_reduction <add>, %14, %cst_9 [1] : vector<8x32xf32> to vector<8xf32>
    %16 = vector.shape_cast %15 : vector<8xf32> to vector<8x1xf32>
    %cst_10 = arith.constant 3.200000e+01 : f32
    %17 = vector.broadcast %cst_10 : f32 to vector<8x1xf32>
    %18 = arith.divf %16, %17 : vector<8x1xf32>
    %19 = vector.broadcast %11 : vector<8x1xf32> to vector<8x32xf32>
    %20 = arith.subf %5, %19 : vector<8x32xf32>
    %cst_11 = arith.constant 9.99999974E-6 : f32
    %21 = vector.broadcast %cst_11 : f32 to vector<8x1xf32>
    %22 = arith.addf %18, %21 : vector<8x1xf32>
    %23 = math.rsqrt %22 : vector<8x1xf32>
    %24 = vector.broadcast %23 : vector<8x1xf32> to vector<8x32xf32>
    %25 = arith.mulf %20, %24 : vector<8x32xf32>
    %26 = vector.broadcast %6 : vector<1x32xf32> to vector<8x32xf32>
    %27 = arith.mulf %25, %26 : vector<8x32xf32>
    %28 = vector.broadcast %7 : vector<1x32xf32> to vector<8x32xf32>
    %29 = arith.addf %27, %28 : vector<8x32xf32>
    %cst_12 = arith.constant 0.000000e+00 : f32
    %30 = vector.broadcast %cst_12 : f32 to vector<8x32xf32>
    %31 = arith.maximumf %29, %30 : vector<8x32xf32>
    %c0_13 = arith.constant 0 : index
    %c0_14 = arith.constant 0 : index
    %32 = vector.load %arg1[%c0_13, %c0_14] : memref<32x768xf32, #tpu.memory_space<vmem>>, vector<32x96xf32>
    %cst_15 = arith.constant dense<0.000000e+00> : vector<8x96xf32>
    %33 = tpu.matmul %31, %32, %cst_15 {dimension_numbers = #tpu.dot_dimension_numbers<[1], [0], [0], [1], [0, 0, 1, 1], [], []>} : vector<8x32xf32>, vector<32x96xf32>, vector<8x96xf32> -> vector<8x96xf32>
    %c3 = arith.constant 3 : index
    %c0_16 = arith.constant 0 : index
    %34 = vector.load %arg3[%c3, %c0_16] : memref<16x128xf32, #tpu.memory_space<vmem>>, vector<1x96xf32>
    %35 = vector.broadcast %34 : vector<1x96xf32> to vector<8x96xf32>
    %36 = arith.addf %33, %35 : vector<8x96xf32>
    %c0_17 = arith.constant 0 : index
    %c128 = arith.constant 128 : index
    %37 = vector.load %arg1[%c0_17, %c128] : memref<32x768xf32, #tpu.memory_space<vmem>>, vector<32x32xf32>
    %38 = vector.extract_strided_slice %36 {offsets = [0, 0], sizes = [8, 8], strides = [1, 1]} : vector<8x96xf32> to vector<8x8xf32>
    %39 = vector.extract_strided_slice %36 {offsets = [0, 32], sizes = [8, 8], strides = [1, 1]} : vector<8x96xf32> to vector<8x8xf32>
    %40 = vector.extract_strided_slice %36 {offsets = [0, 64], sizes = [8, 8], strides = [1, 1]} : vector<8x96xf32> to vector<8x8xf32>
    %cst_18 = arith.constant dense<0.000000e+00> : vector<8x8xf32>
    %41 = tpu.matmul %38, %39, %cst_18 {dimension_numbers = #tpu.dot_dimension_numbers<[1], [1], [0], [0], [0, 0, 1, 0], [], []>} : vector<8x8xf32>, vector<8x8xf32>, vector<8x8xf32> -> vector<8x8xf32>
    %cst_19 = arith.constant 0.353553385 : f32
    %42 = vector.broadcast %cst_19 : f32 to vector<8x8xf32>
    %43 = arith.mulf %41, %42 : vector<8x8xf32>
    %cst_20 = arith.constant dense<0xFF800000> : vector<8xf32>
    %44 = vector.multi_reduction <maximumf>, %43, %cst_20 [1] : vector<8x8xf32> to vector<8xf32>
    %45 = vector.shape_cast %44 : vector<8xf32> to vector<8x1xf32>
    %46 = vector.broadcast %45 : vector<8x1xf32> to vector<8x8xf32>
    %47 = arith.subf %43, %46 : vector<8x8xf32>
    %48 = math.exp %47 : vector<8x8xf32>
    %cst_21 = arith.constant dense<0.000000e+00> : vector<8xf32>
    %49 = vector.multi_reduction <add>, %48, %cst_21 [1] : vector<8x8xf32> to vector<8xf32>
    %50 = vector.shape_cast %49 : vector<8xf32> to vector<8x1xf32>
    %51 = tpu.reciprocal %50 {approx = true} : vector<8x1xf32> -> vector<8x1xf32>
    %52 = vector.broadcast %51 : vector<8x1xf32> to vector<8x8xf32>
    %53 = arith.mulf %48, %52 : vector<8x8xf32>
    %cst_22 = arith.constant dense<0.000000e+00> : vector<8x8xf32>
    %54 = tpu.matmul %53, %40, %cst_22 {dimension_numbers = #tpu.dot_dimension_numbers<[1], [0], [0], [1], [0, 0, 1, 1], [], []>} : vector<8x8xf32>, vector<8x8xf32>, vector<8x8xf32> -> vector<8x8xf32>
    %55 = vector.extract_strided_slice %37 {offsets = [0, 0], sizes = [8, 32], strides = [1, 1]} : vector<32x32xf32> to vector<8x32xf32>
    %cst_23 = arith.constant dense<0.000000e+00> : vector<8x32xf32>
    %56 = tpu.matmul %54, %55, %cst_23 {dimension_numbers = #tpu.dot_dimension_numbers<[1], [0], [0], [1], [0, 0, 1, 1], [], []>} : vector<8x8xf32>, vector<8x32xf32>, vector<8x32xf32> -> vector<8x32xf32>
    %57 = vector.extract_strided_slice %36 {offsets = [0, 8], sizes = [8, 8], strides = [1, 1]} : vector<8x96xf32> to vector<8x8xf32>
    %58 = vector.extract_strided_slice %36 {offsets = [0, 40], sizes = [8, 8], strides = [1, 1]} : vector<8x96xf32> to vector<8x8xf32>
    %59 = vector.extract_strided_slice %36 {offsets = [0, 72], sizes = [8, 8], strides = [1, 1]} : vector<8x96xf32> to vector<8x8xf32>
    %cst_24 = arith.constant dense<0.000000e+00> : vector<8x8xf32>
    %60 = tpu.matmul %57, %58, %cst_24 {dimension_numbers = #tpu.dot_dimension_numbers<[1], [1], [0], [0], [0, 0, 1, 0], [], []>} : vector<8x8xf32>, vector<8x8xf32>, vector<8x8xf32> -> vector<8x8xf32>
    %cst_25 = arith.constant 0.353553385 : f32
    %61 = vector.broadcast %cst_25 : f32 to vector<8x8xf32>
    %62 = arith.mulf %60, %61 : vector<8x8xf32>
    %cst_26 = arith.constant dense<0xFF800000> : vector<8xf32>
    %63 = vector.multi_reduction <maximumf>, %62, %cst_26 [1] : vector<8x8xf32> to vector<8xf32>
    %64 = vector.shape_cast %63 : vector<8xf32> to vector<8x1xf32>
    %65 = vector.broadcast %64 : vector<8x1xf32> to vector<8x8xf32>
    %66 = arith.subf %62, %65 : vector<8x8xf32>
    %67 = math.exp %66 : vector<8x8xf32>
    %cst_27 = arith.constant dense<0.000000e+00> : vector<8xf32>
    %68 = vector.multi_reduction <add>, %67, %cst_27 [1] : vector<8x8xf32> to vector<8xf32>
    %69 = vector.shape_cast %68 : vector<8xf32> to vector<8x1xf32>
    %70 = tpu.reciprocal %69 {approx = true} : vector<8x1xf32> -> vector<8x1xf32>
    %71 = vector.broadcast %70 : vector<8x1xf32> to vector<8x8xf32>
    %72 = arith.mulf %67, %71 : vector<8x8xf32>
    %cst_28 = arith.constant dense<0.000000e+00> : vector<8x8xf32>
    %73 = tpu.matmul %72, %59, %cst_28 {dimension_numbers = #tpu.dot_dimension_numbers<[1], [0], [0], [1], [0, 0, 1, 1], [], []>} : vector<8x8xf32>, vector<8x8xf32>, vector<8x8xf32> -> vector<8x8xf32>
    %74 = vector.extract_strided_slice %37 {offsets = [8, 0], sizes = [8, 32], strides = [1, 1]} : vector<32x32xf32> to vector<8x32xf32>
    %cst_29 = arith.constant dense<0.000000e+00> : vector<8x32xf32>
    %75 = tpu.matmul %73, %74, %cst_29 {dimension_numbers = #tpu.dot_dimension_numbers<[1], [0], [0], [1], [0, 0, 1, 1], [], []>} : vector<8x8xf32>, vector<8x32xf32>, vector<8x32xf32> -> vector<8x32xf32>
    %76 = arith.addf %56, %75 : vector<8x32xf32>
    %77 = vector.extract_strided_slice %36 {offsets = [0, 16], sizes = [8, 8], strides = [1, 1]} : vector<8x96xf32> to vector<8x8xf32>
    %78 = vector.extract_strided_slice %36 {offsets = [0, 48], sizes = [8, 8], strides = [1, 1]} : vector<8x96xf32> to vector<8x8xf32>
    %79 = vector.extract_strided_slice %36 {offsets = [0, 80], sizes = [8, 8], strides = [1, 1]} : vector<8x96xf32> to vector<8x8xf32>
    %cst_30 = arith.constant dense<0.000000e+00> : vector<8x8xf32>
    %80 = tpu.matmul %77, %78, %cst_30 {dimension_numbers = #tpu.dot_dimension_numbers<[1], [1], [0], [0], [0, 0, 1, 0], [], []>} : vector<8x8xf32>, vector<8x8xf32>, vector<8x8xf32> -> vector<8x8xf32>
    %cst_31 = arith.constant 0.353553385 : f32
    %81 = vector.broadcast %cst_31 : f32 to vector<8x8xf32>
    %82 = arith.mulf %80, %81 : vector<8x8xf32>
    %cst_32 = arith.constant dense<0xFF800000> : vector<8xf32>
    %83 = vector.multi_reduction <maximumf>, %82, %cst_32 [1] : vector<8x8xf32> to vector<8xf32>
    %84 = vector.shape_cast %83 : vector<8xf32> to vector<8x1xf32>
    %85 = vector.broadcast %84 : vector<8x1xf32> to vector<8x8xf32>
    %86 = arith.subf %82, %85 : vector<8x8xf32>
    %87 = math.exp %86 : vector<8x8xf32>
    %cst_33 = arith.constant dense<0.000000e+00> : vector<8xf32>
    %88 = vector.multi_reduction <add>, %87, %cst_33 [1] : vector<8x8xf32> to vector<8xf32>
    %89 = vector.shape_cast %88 : vector<8xf32> to vector<8x1xf32>
    %90 = tpu.reciprocal %89 {approx = true} : vector<8x1xf32> -> vector<8x1xf32>
    %91 = vector.broadcast %90 : vector<8x1xf32> to vector<8x8xf32>
    %92 = arith.mulf %87, %91 : vector<8x8xf32>
    %cst_34 = arith.constant dense<0.000000e+00> : vector<8x8xf32>
    %93 = tpu.matmul %92, %79, %cst_34 {dimension_numbers = #tpu.dot_dimension_numbers<[1], [0], [0], [1], [0, 0, 1, 1], [], []>} : vector<8x8xf32>, vector<8x8xf32>, vector<8x8xf32> -> vector<8x8xf32>
    %94 = vector.extract_strided_slice %37 {offsets = [16, 0], sizes = [8, 32], strides = [1, 1]} : vector<32x32xf32> to vector<8x32xf32>
    %cst_35 = arith.constant dense<0.000000e+00> : vector<8x32xf32>
    %95 = tpu.matmul %93, %94, %cst_35 {dimension_numbers = #tpu.dot_dimension_numbers<[1], [0], [0], [1], [0, 0, 1, 1], [], []>} : vector<8x8xf32>, vector<8x32xf32>, vector<8x32xf32> -> vector<8x32xf32>
    %96 = arith.addf %76, %95 : vector<8x32xf32>
    %97 = vector.extract_strided_slice %36 {offsets = [0, 24], sizes = [8, 8], strides = [1, 1]} : vector<8x96xf32> to vector<8x8xf32>
    %98 = vector.extract_strided_slice %36 {offsets = [0, 56], sizes = [8, 8], strides = [1, 1]} : vector<8x96xf32> to vector<8x8xf32>
    %99 = vector.extract_strided_slice %36 {offsets = [0, 88], sizes = [8, 8], strides = [1, 1]} : vector<8x96xf32> to vector<8x8xf32>
    %cst_36 = arith.constant dense<0.000000e+00> : vector<8x8xf32>
    %100 = tpu.matmul %97, %98, %cst_36 {dimension_numbers = #tpu.dot_dimension_numbers<[1], [1], [0], [0], [0, 0, 1, 0], [], []>} : vector<8x8xf32>, vector<8x8xf32>, vector<8x8xf32> -> vector<8x8xf32>
    %cst_37 = arith.constant 0.353553385 : f32
    %101 = vector.broadcast %cst_37 : f32 to vector<8x8xf32>
    %102 = arith.mulf %100, %101 : vector<8x8xf32>
    %cst_38 = arith.constant dense<0xFF800000> : vector<8xf32>
    %103 = vector.multi_reduction <maximumf>, %102, %cst_38 [1] : vector<8x8xf32> to vector<8xf32>
    %104 = vector.shape_cast %103 : vector<8xf32> to vector<8x1xf32>
    %105 = vector.broadcast %104 : vector<8x1xf32> to vector<8x8xf32>
    %106 = arith.subf %102, %105 : vector<8x8xf32>
    %107 = math.exp %106 : vector<8x8xf32>
    %cst_39 = arith.constant dense<0.000000e+00> : vector<8xf32>
    %108 = vector.multi_reduction <add>, %107, %cst_39 [1] : vector<8x8xf32> to vector<8xf32>
    %109 = vector.shape_cast %108 : vector<8xf32> to vector<8x1xf32>
    %110 = tpu.reciprocal %109 {approx = true} : vector<8x1xf32> -> vector<8x1xf32>
    %111 = vector.broadcast %110 : vector<8x1xf32> to vector<8x8xf32>
    %112 = arith.mulf %107, %111 : vector<8x8xf32>
    %cst_40 = arith.constant dense<0.000000e+00> : vector<8x8xf32>
    %113 = tpu.matmul %112, %99, %cst_40 {dimension_numbers = #tpu.dot_dimension_numbers<[1], [0], [0], [1], [0, 0, 1, 1], [], []>} : vector<8x8xf32>, vector<8x8xf32>, vector<8x8xf32> -> vector<8x8xf32>
    %114 = vector.extract_strided_slice %37 {offsets = [24, 0], sizes = [8, 32], strides = [1, 1]} : vector<32x32xf32> to vector<8x32xf32>
    %cst_41 = arith.constant dense<0.000000e+00> : vector<8x32xf32>
    %115 = tpu.matmul %113, %114, %cst_41 {dimension_numbers = #tpu.dot_dimension_numbers<[1], [0], [0], [1], [0, 0, 1, 1], [], []>} : vector<8x8xf32>, vector<8x32xf32>, vector<8x32xf32> -> vector<8x32xf32>
    %116 = arith.addf %96, %115 : vector<8x32xf32>
    %117 = arith.addf %31, %116 : vector<8x32xf32>
    %c4 = arith.constant 4 : index
    %c0_42 = arith.constant 0 : index
    %118 = vector.load %arg3[%c4, %c0_42] : memref<16x128xf32, #tpu.memory_space<vmem>>, vector<1x32xf32>
    %119 = vector.broadcast %118 : vector<1x32xf32> to vector<8x32xf32>
    %120 = arith.addf %117, %119 : vector<8x32xf32>
    %c0_43 = arith.constant 0 : index
    %c256 = arith.constant 256 : index
    %121 = vector.load %arg1[%c0_43, %c256] : memref<32x768xf32, #tpu.memory_space<vmem>>, vector<32x32xf32>
    %cst_44 = arith.constant dense<0.000000e+00> : vector<8x32xf32>
    %122 = tpu.matmul %120, %121, %cst_44 {dimension_numbers = #tpu.dot_dimension_numbers<[1], [0], [0], [1], [0, 0, 1, 1], [], []>} : vector<8x32xf32>, vector<32x32xf32>, vector<8x32xf32> -> vector<8x32xf32>
    %c5 = arith.constant 5 : index
    %c0_45 = arith.constant 0 : index
    %123 = vector.load %arg3[%c5, %c0_45] : memref<16x128xf32, #tpu.memory_space<vmem>>, vector<1x32xf32>
    %124 = vector.broadcast %123 : vector<1x32xf32> to vector<8x32xf32>
    %125 = arith.addf %122, %124 : vector<8x32xf32>
    %c6 = arith.constant 6 : index
    %c0_46 = arith.constant 0 : index
    %126 = vector.load %arg3[%c6, %c0_46] : memref<16x128xf32, #tpu.memory_space<vmem>>, vector<1x32xf32>
    %c7 = arith.constant 7 : index
    %c0_47 = arith.constant 0 : index
    %127 = vector.load %arg3[%c7, %c0_47] : memref<16x128xf32, #tpu.memory_space<vmem>>, vector<1x32xf32>
    %cst_48 = arith.constant dense<0.000000e+00> : vector<8xf32>
    %128 = vector.multi_reduction <add>, %125, %cst_48 [1] : vector<8x32xf32> to vector<8xf32>
    %129 = vector.shape_cast %128 : vector<8xf32> to vector<8x1xf32>
    %cst_49 = arith.constant 3.200000e+01 : f32
    %130 = vector.broadcast %cst_49 : f32 to vector<8x1xf32>
    %131 = arith.divf %129, %130 : vector<8x1xf32>
    %132 = vector.broadcast %131 : vector<8x1xf32> to vector<8x32xf32>
    %133 = arith.subf %125, %132 : vector<8x32xf32>
    %134 = arith.mulf %133, %133 : vector<8x32xf32>
    %cst_50 = arith.constant dense<0.000000e+00> : vector<8xf32>
    %135 = vector.multi_reduction <add>, %134, %cst_50 [1] : vector<8x32xf32> to vector<8xf32>
    %136 = vector.shape_cast %135 : vector<8xf32> to vector<8x1xf32>
    %cst_51 = arith.constant 3.200000e+01 : f32
    %137 = vector.broadcast %cst_51 : f32 to vector<8x1xf32>
    %138 = arith.divf %136, %137 : vector<8x1xf32>
    %139 = vector.broadcast %131 : vector<8x1xf32> to vector<8x32xf32>
    %140 = arith.subf %125, %139 : vector<8x32xf32>
    %cst_52 = arith.constant 9.99999974E-6 : f32
    %141 = vector.broadcast %cst_52 : f32 to vector<8x1xf32>
    %142 = arith.addf %138, %141 : vector<8x1xf32>
    %143 = math.rsqrt %142 : vector<8x1xf32>
    %144 = vector.broadcast %143 : vector<8x1xf32> to vector<8x32xf32>
    %145 = arith.mulf %140, %144 : vector<8x32xf32>
    %146 = vector.broadcast %126 : vector<1x32xf32> to vector<8x32xf32>
    %147 = arith.mulf %145, %146 : vector<8x32xf32>
    %148 = vector.broadcast %127 : vector<1x32xf32> to vector<8x32xf32>
    %149 = arith.addf %147, %148 : vector<8x32xf32>
    %cst_53 = arith.constant 0.000000e+00 : f32
    %150 = vector.broadcast %cst_53 : f32 to vector<8x32xf32>
    %151 = arith.maximumf %149, %150 : vector<8x32xf32>
    %152 = arith.addf %151, %120 : vector<8x32xf32>
    %c0_54 = arith.constant 0 : index
    %c384 = arith.constant 384 : index
    %153 = vector.load %arg1[%c0_54, %c384] : memref<32x768xf32, #tpu.memory_space<vmem>>, vector<32x32xf32>
    %cst_55 = arith.constant dense<0.000000e+00> : vector<8x32xf32>
    %154 = tpu.matmul %152, %153, %cst_55 {dimension_numbers = #tpu.dot_dimension_numbers<[1], [0], [0], [1], [0, 0, 1, 1], [], []>} : vector<8x32xf32>, vector<32x32xf32>, vector<8x32xf32> -> vector<8x32xf32>
    %c8 = arith.constant 8 : index
    %c0_56 = arith.constant 0 : index
    %155 = vector.load %arg3[%c8, %c0_56] : memref<16x128xf32, #tpu.memory_space<vmem>>, vector<1x32xf32>
    %156 = vector.broadcast %155 : vector<1x32xf32> to vector<8x32xf32>
    %157 = arith.addf %154, %156 : vector<8x32xf32>
    %c9 = arith.constant 9 : index
    %c0_57 = arith.constant 0 : index
    %158 = vector.load %arg3[%c9, %c0_57] : memref<16x128xf32, #tpu.memory_space<vmem>>, vector<1x32xf32>
    %c10 = arith.constant 10 : index
    %c0_58 = arith.constant 0 : index
    %159 = vector.load %arg3[%c10, %c0_58] : memref<16x128xf32, #tpu.memory_space<vmem>>, vector<1x32xf32>
    %cst_59 = arith.constant dense<0.000000e+00> : vector<8xf32>
    %160 = vector.multi_reduction <add>, %157, %cst_59 [1] : vector<8x32xf32> to vector<8xf32>
    %161 = vector.shape_cast %160 : vector<8xf32> to vector<8x1xf32>
    %cst_60 = arith.constant 3.200000e+01 : f32
    %162 = vector.broadcast %cst_60 : f32 to vector<8x1xf32>
    %163 = arith.divf %161, %162 : vector<8x1xf32>
    %164 = vector.broadcast %163 : vector<8x1xf32> to vector<8x32xf32>
    %165 = arith.subf %157, %164 : vector<8x32xf32>
    %166 = arith.mulf %165, %165 : vector<8x32xf32>
    %cst_61 = arith.constant dense<0.000000e+00> : vector<8xf32>
    %167 = vector.multi_reduction <add>, %166, %cst_61 [1] : vector<8x32xf32> to vector<8xf32>
    %168 = vector.shape_cast %167 : vector<8xf32> to vector<8x1xf32>
    %cst_62 = arith.constant 3.200000e+01 : f32
    %169 = vector.broadcast %cst_62 : f32 to vector<8x1xf32>
    %170 = arith.divf %168, %169 : vector<8x1xf32>
    %171 = vector.broadcast %163 : vector<8x1xf32> to vector<8x32xf32>
    %172 = arith.subf %157, %171 : vector<8x32xf32>
    %cst_63 = arith.constant 9.99999974E-6 : f32
    %173 = vector.broadcast %cst_63 : f32 to vector<8x1xf32>
    %174 = arith.addf %170, %173 : vector<8x1xf32>
    %175 = math.rsqrt %174 : vector<8x1xf32>
    %176 = vector.broadcast %175 : vector<8x1xf32> to vector<8x32xf32>
    %177 = arith.mulf %172, %176 : vector<8x32xf32>
    %178 = vector.broadcast %158 : vector<1x32xf32> to vector<8x32xf32>
    %179 = arith.mulf %177, %178 : vector<8x32xf32>
    %180 = vector.broadcast %159 : vector<1x32xf32> to vector<8x32xf32>
    %181 = arith.addf %179, %180 : vector<8x32xf32>
    %cst_64 = arith.constant 0.000000e+00 : f32
    %182 = vector.broadcast %cst_64 : f32 to vector<8x32xf32>
    %183 = arith.maximumf %181, %182 : vector<8x32xf32>
    %184 = arith.addf %183, %152 : vector<8x32xf32>
    %c0_65 = arith.constant 0 : index
    %c512 = arith.constant 512 : index
    %185 = vector.load %arg1[%c0_65, %c512] : memref<32x768xf32, #tpu.memory_space<vmem>>, vector<32x32xf32>
    %cst_66 = arith.constant dense<0.000000e+00> : vector<8x32xf32>
    %186 = tpu.matmul %184, %185, %cst_66 {dimension_numbers = #tpu.dot_dimension_numbers<[1], [0], [0], [1], [0, 0, 1, 1], [], []>} : vector<8x32xf32>, vector<32x32xf32>, vector<8x32xf32> -> vector<8x32xf32>
    %c11 = arith.constant 11 : index
    %c0_67 = arith.constant 0 : index
    %187 = vector.load %arg3[%c11, %c0_67] : memref<16x128xf32, #tpu.memory_space<vmem>>, vector<1x32xf32>
    %188 = vector.broadcast %187 : vector<1x32xf32> to vector<8x32xf32>
    %189 = arith.addf %186, %188 : vector<8x32xf32>
    %c12 = arith.constant 12 : index
    %c0_68 = arith.constant 0 : index
    %190 = vector.load %arg3[%c12, %c0_68] : memref<16x128xf32, #tpu.memory_space<vmem>>, vector<1x32xf32>
    %c13 = arith.constant 13 : index
    %c0_69 = arith.constant 0 : index
    %191 = vector.load %arg3[%c13, %c0_69] : memref<16x128xf32, #tpu.memory_space<vmem>>, vector<1x32xf32>
    %cst_70 = arith.constant dense<0.000000e+00> : vector<8xf32>
    %192 = vector.multi_reduction <add>, %189, %cst_70 [1] : vector<8x32xf32> to vector<8xf32>
    %193 = vector.shape_cast %192 : vector<8xf32> to vector<8x1xf32>
    %cst_71 = arith.constant 3.200000e+01 : f32
    %194 = vector.broadcast %cst_71 : f32 to vector<8x1xf32>
    %195 = arith.divf %193, %194 : vector<8x1xf32>
    %196 = vector.broadcast %195 : vector<8x1xf32> to vector<8x32xf32>
    %197 = arith.subf %189, %196 : vector<8x32xf32>
    %198 = arith.mulf %197, %197 : vector<8x32xf32>
    %cst_72 = arith.constant dense<0.000000e+00> : vector<8xf32>
    %199 = vector.multi_reduction <add>, %198, %cst_72 [1] : vector<8x32xf32> to vector<8xf32>
    %200 = vector.shape_cast %199 : vector<8xf32> to vector<8x1xf32>
    %cst_73 = arith.constant 3.200000e+01 : f32
    %201 = vector.broadcast %cst_73 : f32 to vector<8x1xf32>
    %202 = arith.divf %200, %201 : vector<8x1xf32>
    %203 = vector.broadcast %195 : vector<8x1xf32> to vector<8x32xf32>
    %204 = arith.subf %189, %203 : vector<8x32xf32>
    %cst_74 = arith.constant 9.99999974E-6 : f32
    %205 = vector.broadcast %cst_74 : f32 to vector<8x1xf32>
    %206 = arith.addf %202, %205 : vector<8x1xf32>
    %207 = math.rsqrt %206 : vector<8x1xf32>
    %208 = vector.broadcast %207 : vector<8x1xf32> to vector<8x32xf32>
    %209 = arith.mulf %204, %208 : vector<8x32xf32>
    %210 = vector.broadcast %190 : vector<1x32xf32> to vector<8x32xf32>
    %211 = arith.mulf %209, %210 : vector<8x32xf32>
    %212 = vector.broadcast %191 : vector<1x32xf32> to vector<8x32xf32>
    %213 = arith.addf %211, %212 : vector<8x32xf32>
    %cst_75 = arith.constant 0.000000e+00 : f32
    %214 = vector.broadcast %cst_75 : f32 to vector<8x32xf32>
    %215 = arith.maximumf %213, %214 : vector<8x32xf32>
    %216 = arith.addf %215, %184 : vector<8x32xf32>
    %c0_76 = arith.constant 0 : index
    %c640 = arith.constant 640 : index
    %217 = vector.load %arg1[%c0_76, %c640] : memref<32x768xf32, #tpu.memory_space<vmem>>, vector<32x16xf32>
    %cst_77 = arith.constant dense<0.000000e+00> : vector<8x16xf32>
    %218 = tpu.matmul %216, %217, %cst_77 {dimension_numbers = #tpu.dot_dimension_numbers<[1], [0], [0], [1], [0, 0, 1, 1], [], []>} : vector<8x32xf32>, vector<32x16xf32>, vector<8x16xf32> -> vector<8x16xf32>
    %c14 = arith.constant 14 : index
    %c0_78 = arith.constant 0 : index
    %219 = vector.load %arg3[%c14, %c0_78] : memref<16x128xf32, #tpu.memory_space<vmem>>, vector<1x16xf32>
    %220 = vector.broadcast %219 : vector<1x16xf32> to vector<8x16xf32>
    %221 = arith.addf %218, %220 : vector<8x16xf32>
    %cst_79 = arith.constant 0.000000e+00 : f32
    %222 = vector.broadcast %cst_79 : f32 to vector<8x16xf32>
    %223 = arith.maximumf %221, %222 : vector<8x16xf32>
    %c0_80 = arith.constant 0 : index
    %c128_81 = arith.constant 128 : index
    %224 = vector.load %arg2[%c0_80, %c128_81] : memref<16x256xf32, #tpu.memory_space<vmem>>, vector<16x8xf32>
    %cst_82 = arith.constant dense<0.000000e+00> : vector<8x8xf32>
    %225 = tpu.matmul %223, %224, %cst_82 {dimension_numbers = #tpu.dot_dimension_numbers<[1], [0], [0], [1], [0, 0, 1, 1], [], []>} : vector<8x16xf32>, vector<16x8xf32>, vector<8x8xf32> -> vector<8x8xf32>
    %c15 = arith.constant 15 : index
    %c0_83 = arith.constant 0 : index
    %226 = vector.load %arg3[%c15, %c0_83] : memref<16x128xf32, #tpu.memory_space<vmem>>, vector<1x8xf32>
    %227 = vector.broadcast %226 : vector<1x8xf32> to vector<8x8xf32>
    %228 = arith.addf %225, %227 : vector<8x8xf32>
    %c0_84 = arith.constant 0 : index
    %c0_85 = arith.constant 0 : index
    %229 = vector.load %arg4[%c0_84, %c0_85] : memref<8x8xf32, #tpu.memory_space<vmem>>, vector<8x8xf32>
    tpu.vector_store %arg4[%c0_84, %c0_85], %228 {strides = array<i32>} : memref<8x8xf32, #tpu.memory_space<vmem>>, vector<8x8xf32>,
    return
  }
}

</mosaic_0001>

<bundles_post_ra>
// kernel: tpu_custom_call.1
= control target key start
LH: loop header
LB: loop body
LE: loop exit
PB: predicated region body
PF: predicated region fallthrough
CT: control target
= control target key end

     0   :  { %9 = vsyncpa [#allocation3], 0  ;;  %s1147_s0 = inlined_call_operand.hbm [shape: f32[8,16], index: 0, kind: input, shape index: {}]   ;;  %s1148_s1 = inlined_call_operand.hbm [shape: f32[32,768], index: 1, kind: input, shape index: {}]   ;;  %s1149_s2 = inlined_call_operand.hbm [shape: f32[16,256], index: 2, kind: input, shape index: {}]   ;;  %s1150_s3 = inlined_call_operand.hbm [shape: f32[16,128], index: 3, kind: input, shape index: {}]   ;;  %s1151_s4 = inlined_call_operand.hbm [shape: f32[8,8], index: 4, kind: output, shape index: {}]  }
   0x1   :  { %10 = vsyncpa [#allocation6], 0 }
   0x2   :  { %11 = vsyncpa [#allocation9], 0  ;;  %s28_s17 = sshll.u32 %s1148_s1, 4  ;;  %s29_s17 = int_to_ptr.hbm [resolvable:$true] %s28_s17 }
   0x3   :  { %12 = vsyncpa [#allocation4], 0  ;;  %s1009_s18 = smov [#allocation5]   ;;  %s18_s22 = sshll.u32 %s1147_s0, 4  ;;  %s19_s22 = int_to_ptr.hbm [resolvable:$true] %s18_s22 }
   0x4   :  { %s30_s19 = sshll.u32 %s1009_s18, 4  ;;  %s1010_s23 = smov 768   ;;  %s31_s19 = int_to_ptr.vmem [resolvable:$true] %s30_s19 }
   0x5   :  { %s1011_s24 = smov 48   ;;  %s1012_s25 = smov [#allocation2]  }
   0x6   :  { %36 = dma.hbm_to_vmem [thread:$0]  %s29_s17, 3072, %s31_s19, [#allocation6], %s1010_s23, %s1010_s23, %s1011_s24  }
   0x7   :  { %s20_s26 = sshll.u32 %s1012_s25, 4  ;;  %s41_s1 = sshll.u32 %s1149_s2, 4  ;;  %s21_s26 = int_to_ptr.vmem [resolvable:$true] %s20_s26  ;;  %s42_s1 = int_to_ptr.hbm [resolvable:$true] %s41_s1 }
   0x8   :  { %23 = dma.hbm_to_vmem [thread:$0]  %s19_s22, 128, %s21_s26, [#allocation3]  }
   0x9   :  { %s1013_s29 = smov [#allocation7]   ;;  %s54_s0 = sshll.u32 %s1150_s3, 4  ;;  %s55_s0 = int_to_ptr.hbm [resolvable:$true] %s54_s0 }
   0xa   :  { %s43_s30 = sshll.u32 %s1013_s29, 4  ;;  %s1014_s7 = smov 256   ;;  %s44_s30 = int_to_ptr.vmem [resolvable:$true] %s43_s30 }
   0xb   :  { %s1015_s8 = smov 16   ;;  %s1016_s9 = smov [#allocation8]  }
   0xc   :  { %49 = dma.hbm_to_vmem [thread:$0]  %s42_s1, 512, %s44_s30, [#allocation6], %s1014_s7, %s1014_s7, %s1015_s8  }
   0xd   :  { %s56_s10 = sshll.u32 %s1016_s9, 4  ;;  %s1017_s11 = smov 128   ;;  %s57_s10 = int_to_ptr.vmem [resolvable:$true] %s56_s10 }
   0xe   :  { %s1018_s12 = smov 8  }
   0xf   :  { %62 = dma.hbm_to_vmem [thread:$0]  %s55_s0, 256, %s57_s10, [#allocation9], %s1017_s11, %s1017_s11, %s1018_s12  }
  0x10   :  { %1001 = dma.done.wait [#allocation3], 128  }
  0x11   :  { %1002 = vsyncadd [#allocation3], 4294967168 }
  0x12   :  { %1003 = dma.done.wait [#allocation6], 3584  }
  0x13   :  { %1004 = vsyncadd [#allocation6], 4294963712 }
  0x14   :  { %1005 = dma.done.wait [#allocation9], 256  }
  0x15   :  { %1006 = vsyncadd [#allocation9], 4294967040  ;;  %v81_v0 = vld [vmem:[#allocation7 + $0x10] sm:$0xff]  ;;  %v80_v1 = vld [vmem:[#allocation7] sm:$0xff]  ;;  %vm84_vm0 = vcmask 130048   ;;  %vm110_vm1 = vcmask 261120  }
  0x16   :  { %102 = vmatpush.msra.mxu0 %v81_v0  ;;  %v79_v2 = vld [vmem:[#allocation2] sm:$0xff]  ;;  %v839_v3 = vld [vmem:[#allocation8] ss:$0 sm:$0xff]  ;;  %v1019_v7 = vmov 32.0   ;;  %v148_v19 = vld [vmem:[#allocation5 + $0x90] sm:$0xff]  ;;  %s1020_s2 = smov 88  }
  0x17   :  { %855 = vrcp.f32 %v1019_v7  ;;  %v147_v20 = vld [vmem:[#allocation5 + $0x60] sm:$0xff]  ;;  %166 = vmatpush.msra.mxu1 %v148_v19  ;;  %v146_v21 = vld [vmem:[#allocation5 + $0x30] sm:$0xff]  ;;  %s1021_s3 = smov 96   ;;  %s1022_s13 = smov 80   ;;  %v174_v42 = vld [vmem:[#allocation5 + $0x8] sm:$0xff]  ;;  %vm181_vm6 = vcmask 64512  }
  0x18   :  { %103 = vmatpush.msra.mxu0 %v80_v1  ;;  %v145_v22 = vld [vmem:[#allocation5] sm:$0xff]  ;;  %s1023_s14 = smov 72   ;;  %s1024_s15 = smov 64  }
  0x19   :  { %794 = vmatmul.msk.f32.vlgmr.msra.gmra.mxu0 %vm84_vm0, %v79_v2  ;;  %167 = vmatpush.msra.mxu1 %v147_v20  ;;  %v840_v32 = vld [vmem:[#allocation8 + $0x1] ss:$0 sm:$0xff]  ;;  %v841_v35 = vld [vmem:[#allocation8 + $0x2] ss:$0 sm:$0xff]  ;;  %v842_v39 = vld [vmem:[#allocation8 + $0x3] ss:$0 sm:$0xff] }
  0x1a   :  { %s1025_s16 = smov 120   ;;  %s1026_s17 = smov 112  }
  0x1b   :  { %168 = vmatpush.msra.mxu1 %v146_v21  ;;  %s1027_s18 = smov 104   ;;  %s1028_s19 = smov 56  }
  0x1c   :  { %s1029_s20 = smov 40   ;;  %s1030_s21 = smov [#allocation10]  }
  0x1d   :  { %v856_v8 = vpop.eup %855  ;;  %169 = vmatpush.msra.mxu1 %v145_v22  ;;  %s780_s22 = sshll.u32 %s1030_s21, 4  ;;  %s782_s25 = sshll.u32 %s1151_s4, 4  ;;  %s781_s22 = int_to_ptr.vmem [resolvable:$true] %s780_s22  ;;  %s783_s25 = int_to_ptr.hbm [resolvable:$true] %s782_s25 }
  0x1e   :  { %v115_v9 = vmul.f32 32.0, %v856_v8  ;;  %vm119_vm2 = vweird.f32 %v856_v8 }
  0x1f   :  { %351 = vmatpush.msrb.mxu1 %v174_v42 }
  0x20   :  { %v116_v10 = vsub.f32 1.0, %v115_v9 }
  0x22   :  { %v117_v11 = vmul.f32 %v856_v8, %v116_v10 }
  0x24   :  { %v118_v12 = vadd.f32 %v856_v8, %v117_v11 }
  0x26   :  { %v1071_v13 = vsel %vm119_vm2, %v856_v8, %v118_v12 }
  0x96   :  { %v105_v4 = vpop.f32.mrf.mxu0 }
  0x97   :  { %v106_v5 = vadd.f32 %v839_v3, %v105_v4 }
  0x99   :  { %v111_v6 = vsel %vm110_vm1, %v106_v5, 0.0 }
  0x9a   :  { %112 = vadd.xlane.f32.xlu0 %v111_v6 }
 0x10d   :  { %v113_v14 = vpop.xlane.xlu0 %112 }
 0x10e   :  { %v121_v15 = vmul.f32 %v1071_v13, %v113_v14 }
 0x110   :  { %v122_v16 = vsub.f32 %v106_v5, %v121_v15 }
 0x112   :  { %v123_v17 = vmul.f32 %v122_v16, %v122_v16 }
 0x114   :  { %v124_v18 = vsel %vm110_vm1, %v123_v17, 0.0 }
 0x115   :  { %125 = vadd.xlane.f32.xlu0 %v124_v18 }
 0x188   :  { %v126_v23 = vpop.xlane.xlu0 %125 }
 0x189   :  { %v127_v24 = vmul.f32 %v126_v23, %v1071_v13 }
 0x18b   :  { %v128_v25 = vadd.f32 1e-05, %v127_v24 }
 0x18d   :  { %857 = vrsqrt.f32 %v128_v25  ;;  %vm135_vm4 = vweird.f32 %v128_v25 }
 0x193   :  { %v858_v26 = vpop.eup %857 }
 0x194   :  { %v130_v27 = vmul.f32 %v858_v26, %v128_v25  ;;  %vm136_vm3 = vweird.f32 %v858_v26 }
 0x195   :  { %vm137_vm5 = vmor %vm135_vm4, %vm136_vm3 }
 0x196   :  { %v131_v28 = vmul.f32 %v858_v26, %v130_v27 }
 0x198   :  { %v132_v29 = vmul.f32 0.5, %v131_v28 }
 0x19a   :  { %v133_v30 = vsub.f32 1.5, %v132_v29 }
 0x19c   :  { %v134_v31 = vmul.f32 %v858_v26, %v133_v30 }
 0x19e   :  { %v138_v33 = vsel %vm137_vm5, %v858_v26, %v134_v31 }
 0x19f   :  { %v139_v34 = vmul.f32 %v138_v33, %v122_v16 }
 0x1a1   :  { %v141_v36 = vmul.f32 %v840_v32, %v139_v34  ;;  %v175_v34 = vld [vmem:[#allocation5 + $0x38] sm:$0xff] }
 0x1a3   :  { %v1076_v37 = vadd.f32 %v841_v35, %v141_v36  ;;  %v176_v35 = vld [vmem:[#allocation5 + $0x68] sm:$0xff]  ;;  %v177_v36 = vld [vmem:[#allocation5 + $0x98] sm:$0xff] }
 0x1a5   :  { %v144_v38 = vmax.f32 %v1076_v37, 0.0  ;;  %v601_v37 = vld [vmem:[#allocation5 + $0x78] sm:$0xff] }
 0x1a7   :  { %795 = vmatmul.msk.f32.vlgmr.msra.gmra.mxu1 %vm110_vm1, %v144_v38 }
 0x224   :  { %v171_v40 = vpop.f32.mrf.mxu1 }
 0x225   :  { %v1082_v41 = vadd.f32 %v842_v39, %v171_v40 }
 0x227   :  { %246 = vrot.lane.b32.xlu0 %v1082_v41, %s1020_s2  ;;  %179 = vrot.lane.b32.xlu1 %v1082_v41, %s1021_s3 }
 0x22f   :  { %358 = vrot.lane.b32.xlu0 %v1082_v41, %s1022_s13 }
 0x237   :  { %448 = vrot.lane.b32.xlu0 %v1082_v41, %s1023_s14 }
 0x299   :  { %v247_v43 = vpop.permute.xlu0 %246  ;;  %v180_v44 = vpop.permute.xlu1 %179 }
 0x29a   :  { %796 = vmatpush.xpose.msk.msra.mxu2 %vm181_vm6, %v180_v44  ;;  %v543_v44 = vld [vmem:[#allocation5 + $0xa0] sm:$0xff] }
 0x29d   :  { %797 = vmatmul.msk.f32.vlgmr.msra.gmra.mxu2 %vm181_vm6, %v1082_v41 }
 0x29e   :  { %328 = vmatpush.msrb.mxu2 %v175_v34  ;;  %v659_v34 = vld [vmem:[#allocation5 + $0x50] sm:$0xff] }
 0x2a0   :  { %440 = vmatpush.msra.mxu2 %v176_v35  ;;  %v658_v35 = vld [vmem:[#allocation5 + $0x20] sm:$0xff] }
 0x2a1   :  { %v359_v45 = vpop.permute.xlu0 %358 }
 0x2a9   :  { %v449_v46 = vpop.permute.xlu0 %448 }
 0x2aa   :  { %808 = vmatpush.xpose.msk.msra.mxu1 %vm181_vm6, %v449_v46  ;;  %v542_v46 = vld [vmem:[#allocation5 + $0x70] sm:$0xff] }
 0x320   :  { %v203_v47 = vpop.f32.mrf.mxu2 }
 0x321   :  { %v206_v48 = vmul.f32 0.35355338, %v203_v47  ;;  %v541_v47 = vld [vmem:[#allocation5 + $0x40] sm:$0xff] }
 0x323   :  { %v207_v49 = vsel %vm181_vm6, %v206_v48, -inf }
 0x324   :  { %208 = vmax.xlane.f32.xlu1 %v207_v49 }
 0x397   :  { %v209_v50 = vpop.xlane.xlu1 %208 }
 0x398   :  { %v210_v51 = vsub.f32 %v206_v48, %v209_v50  ;;  %v540_v48 = vld [vmem:[#allocation5 + $0x10] sm:$0xff] }
 0x39a   :  { %v211_v52 = vmul.f32 1.442695, %v210_v51 }
 0x39c   :  { %859 = vpow2.f32 %v211_v52 }
 0x3a2   :  { %v860_v53 = vpop.eup %859 }
 0x3a3   :  { %v213_v54 = vsel %vm181_vm6, %v860_v53, 0.0 }
 0x3a4   :  { %214 = vadd.xlane.f32.xlu2 %v213_v54 }
 0x3bc   :  { %218 = vrot.lane.b32.xlu2 %v1082_v41, %s1024_s15 }
 0x3c4   :  { %244 = vrot.lane.b32.xlu2 %v1082_v41, %s1025_s16 }
 0x3cc   :  { %356 = vrot.lane.b32.xlu2 %v1082_v41, %s1026_s17 }
 0x3d4   :  { %446 = vrot.lane.b32.xlu2 %v1082_v41, %s1027_s18 }
 0x417   :  { %v215_v55 = vpop.xlane.xlu2 %214 }
 0x418   :  { %861 = vrcp.f32 %v215_v55  ;;  %v843_v55 = vld [vmem:[#allocation8 + $0x4] ss:$0 sm:$0xff] }
 0x41e   :  { %v862_v56 = vpop.eup %861 }
 0x41f   :  { %v219_v57 = vpop.permute.xlu2 %218  ;;  %v217_v58 = vmul.f32 %v862_v56, %v860_v53 }
 0x420   :  { %239 = vmatpush.msra.mxu3 %v219_v57 }
 0x421   :  { %798 = vmatmul.msk.f32.vlgmr.msra.gmra.mxu3 %vm181_vm6, %v217_v58  ;;  %v844_v58 = vld [vmem:[#allocation8 + $0x5] ss:$0 sm:$0xff] }
 0x422   :  { %799 = vmatpush.xpose.msk.msrb.mxu3 %vm181_vm6, %v247_v43 }
 0x426   :  { %804 = vmatpush.xpose.msk.msra.mxu3 %vm181_vm6, %v359_v45 }
 0x427   :  { %v245_v59 = vpop.permute.xlu2 %244 }
 0x429   :  { %800 = vmatmul.msk.f32.vlgmr.msrb.gmra.mxu3 %vm181_vm6, %v245_v59 }
 0x42f   :  { %v357_v60 = vpop.permute.xlu2 %356 }
 0x431   :  { %805 = vmatmul.msk.f32.vlgmr.msra.gmra.mxu3 %vm181_vm6, %v357_v60 }
 0x437   :  { %v447_v62 = vpop.permute.xlu2 %446 }
 0x4a4   :  { %v241_v61 = vpop.f32.mrf.mxu3 }
 0x4a5   :  { %803 = vmatmul.msk.f32.vlgmr.msrb.gmra.mxu1 %vm181_vm6, %v241_v61 }
 0x4ac   :  { %v269_v63 = vpop.f32.mrf.mxu3 }
 0x4ad   :  { %v272_v0 = vmul.f32 0.35355338, %v269_v63  ;;  %809 = vmatmul.msk.f32.vlgmr.msra.gmra.mxu1 %vm181_vm6, %v447_v62 }
 0x4af   :  { %v273_v1 = vsel %vm181_vm6, %v272_v0, -inf }
 0x4b0   :  { %274 = vmax.xlane.f32.xlu1 %v273_v1 }
 0x4b4   :  { %v381_v2 = vpop.f32.mrf.mxu3 }
 0x4b5   :  { %v384_v3 = vmul.f32 0.35355338, %v381_v2 }
 0x4b7   :  { %v385_v4 = vsel %vm181_vm6, %v384_v3, -inf }
 0x4b8   :  { %386 = vmax.xlane.f32.xlu0 %v385_v4  ;;  %v599_v4 = vld [vmem:[#allocation5 + $0x18] sm:$0xff] }
 0x4c9   :  { %284 = vrot.lane.b32.xlu1 %v1082_v41, %s1028_s19 }
 0x522   :  { %v1108_v5 = vpop.f32.mrf.mxu1 }
 0x523   :  { %v275_v6 = vpop.xlane.xlu1 %274 }
 0x524   :  { %v276_v7 = vsub.f32 %v272_v0, %v275_v6 }
 0x526   :  { %v277_v8 = vmul.f32 1.442695, %v276_v7 }
 0x528   :  { %863 = vpow2.f32 %v277_v8 }
 0x52a   :  { %v471_v9 = vpop.f32.mrf.mxu1 }
 0x52b   :  { %v474_v10 = vmul.f32 0.35355338, %v471_v9  ;;  %v387_v11 = vpop.xlane.xlu0 %386 }
 0x52c   :  { %v388_v12 = vsub.f32 %v384_v3, %v387_v11  ;;  %v602_v3 = vld [vmem:[#allocation5 + $0xa8] sm:$0xff] }
 0x52d   :  { %v475_v14 = vsel %vm181_vm6, %v474_v10, -inf  ;;  %620 = vmatpush.msrb.mxu1 %v602_v3  ;;  %v717_v3 = vld [vmem:[#allocation5 + $0x28] sm:$0xff] }
 0x52e   :  { %v864_v15 = vpop.eup %863  ;;  %v389_v16 = vmul.f32 1.442695, %v388_v12  ;;  %476 = vmax.xlane.f32.xlu2 %v475_v14 }
 0x52f   :  { %v279_v17 = vsel %vm181_vm6, %v864_v15, 0.0  ;;  %621 = vmatpush.msrb.mxu1 %v601_v37 }
 0x530   :  { %865 = vpow2.f32 %v389_v16  ;;  %280 = vadd.xlane.f32.xlu1 %v279_v17  ;;  %v846_v17 = vld [vmem:[#allocation8 + $0x7] ss:$0 sm:$0xff] }
 0x536   :  { %v866_v18 = vpop.eup %865 }
 0x537   :  { %v391_v19 = vsel %vm181_vm6, %v866_v18, 0.0 }
 0x538   :  { %392 = vadd.xlane.f32.xlu1 %v391_v19 }
 0x53b   :  { %v285_v20 = vpop.permute.xlu1 %284 }
 0x53c   :  { %305 = vmatpush.msrb.mxu0 %v285_v20 }
 0x546   :  { %396 = vrot.lane.b32.xlu2 %v1082_v41, %s1011_s24 }
 0x551   :  { %486 = vrot.lane.b32.xlu1 %v1082_v41, %s1029_s20 }
 0x5a1   :  { %v477_v21 = vpop.xlane.xlu2 %476 }
 0x5a2   :  { %v478_v22 = vsub.f32 %v474_v10, %v477_v21 }
 0x5a3   :  { %v281_v23 = vpop.xlane.xlu1 %280 }
 0x5a4   :  { %v479_v24 = vmul.f32 1.442695, %v478_v22  ;;  %867 = vrcp.f32 %v281_v23  ;;  %v847_v23 = vld [vmem:[#allocation8 + $0x8] ss:$0 sm:$0xff] }
 0x5a6   :  { %869 = vpow2.f32 %v479_v24 }
 0x5a9   :  { %v397_v25 = vpop.permute.xlu2 %396 }
 0x5aa   :  { %v868_v26 = vpop.eup %867  ;;  %417 = vmatpush.msra.mxu0 %v397_v25 }
 0x5ab   :  { %v393_v27 = vpop.xlane.xlu1 %392  ;;  %v283_v28 = vmul.f32 %v868_v26, %v864_v15  ;;  %v845_v15 = vld [vmem:[#allocation8 + $0x6] ss:$0 sm:$0xff] }
 0x5ac   :  { %v870_v29 = vpop.eup %869  ;;  %871 = vrcp.f32 %v393_v27 }
 0x5ad   :  { %801 = vmatmul.msk.f32.vlgmr.msrb.gmra.mxu0 %vm181_vm6, %v283_v28  ;;  %v481_v30 = vsel %vm181_vm6, %v870_v29, 0.0 }
 0x5ae   :  { %482 = vadd.xlane.f32.xlu0 %v481_v30  ;;  %530 = vmatpush.msrb.mxu0 %v177_v36 }
 0x5b2   :  { %v872_v31 = vpop.eup %871 }
 0x5b3   :  { %v395_v32 = vmul.f32 %v872_v31, %v866_v18 }
 0x5b5   :  { %806 = vmatmul.msk.f32.vlgmr.msra.gmra.mxu0 %vm181_vm6, %v395_v32  ;;  %v661_v32 = vld [vmem:[#allocation5 + $0xb0] sm:$0xff] }
 0x5c3   :  { %v487_v33 = vpop.permute.xlu1 %486 }
 0x5c4   :  { %507 = vmatpush.msrb.mxu3 %v487_v33  ;;  %v660_v33 = vld [vmem:[#allocation5 + $0x80] sm:$0xff] }
 0x5c6   :  { %679 = vmatpush.msra.mxu3 %v661_v32 }
 0x5c8   :  { %680 = vmatpush.msra.mxu3 %v660_v33 }
 0x5ca   :  { %681 = vmatpush.msra.mxu3 %v659_v34 }
 0x5cc   :  { %682 = vmatpush.msra.mxu3 %v658_v35 }
 0x621   :  { %v483_v39 = vpop.xlane.xlu0 %482 }
 0x622   :  { %873 = vrcp.f32 %v483_v39 }
 0x628   :  { %v874_v40 = vpop.eup %873 }
 0x629   :  { %v485_v41 = vmul.f32 %v874_v40, %v870_v29 }
 0x62a   :  { %v307_v42 = vpop.f32.mrf.mxu0 }
 0x62b   :  { %802 = vmatmul.msk.f32.vlgmr.msrb.gmra.mxu2 %vm181_vm6, %v307_v42  ;;  %810 = vmatmul.msk.f32.vlgmr.msrb.gmra.mxu3 %vm181_vm6, %v485_v41 }
 0x62c   :  { %561 = vmatpush.msrb.mxu2 %v543_v44 }
 0x62e   :  { %562 = vmatpush.msrb.mxu2 %v542_v46 }
 0x630   :  { %563 = vmatpush.msrb.mxu2 %v541_v47  ;;  %v848_v47 = vld [vmem:[#allocation8 + $0x9] ss:$0 sm:$0xff] }
 0x632   :  { %v419_v43 = vpop.f32.mrf.mxu0  ;;  %564 = vmatpush.msrb.mxu2 %v540_v48 }
 0x633   :  { %807 = vmatmul.msk.f32.vlgmr.msra.gmra.mxu2 %vm181_vm6, %v419_v43 }
 0x6ae   :  { %v509_v45 = vpop.f32.mrf.mxu3  ;;  %v330_v49 = vpop.f32.mrf.mxu2 }
 0x6af   :  { %811 = vmatmul.msk.f32.vlgmr.msrb.gmra.mxu0 %vm181_vm6, %v509_v45  ;;  %v354_v51 = vadd.f32 %v1108_v5, %v330_v49  ;;  %v849_v49 = vld [vmem:[#allocation8 + $0xa] ss:$0 sm:$0xff] }
 0x6b6   :  { %v442_v50 = vpop.f32.mrf.mxu2 }
 0x6b7   :  { %v445_v52 = vadd.f32 %v442_v50, %v354_v51 }
 0x72c   :  { %v532_v53 = vpop.f32.mrf.mxu0 }
 0x72d   :  { %v535_v54 = vadd.f32 %v532_v53, %v445_v52 }
 0x72f   :  { %v536_v56 = vadd.f32 %v535_v54, %v144_v38  ;;  %v600_v38 = vld [vmem:[#allocation5 + $0x48] sm:$0xff] }
 0x730   :  { %622 = vmatpush.msrb.mxu1 %v600_v38 }
 0x731   :  { %v539_v57 = vadd.f32 %v843_v55, %v536_v56  ;;  %v850_v55 = vld [vmem:[#allocation8 + $0xb] ss:$0 sm:$0xff] }
 0x732   :  { %623 = vmatpush.msrb.mxu1 %v599_v4  ;;  %v748_v4 = vld [vmem:[#allocation7 + $0x18] sm:$0xff] }
 0x733   :  { %812 = vmatmul.msk.f32.vlgmr.msrb.gmra.mxu2 %vm110_vm1, %v539_v57 }
 0x734   :  { %768 = vmatpush.msra.mxu2 %v748_v4 }
 0x7b6   :  { %v566_v59 = vpop.f32.mrf.mxu2 }
 0x7b7   :  { %v567_v60 = vadd.f32 %v844_v58, %v566_v59 }
 0x7b9   :  { %v571_v61 = vsel %vm110_vm1, %v567_v60, 0.0 }
 0x7ba   :  { %572 = vadd.xlane.f32.xlu0 %v571_v61 }
 0x82d   :  { %v573_v62 = vpop.xlane.xlu0 %572 }
 0x82e   :  { %v574_v63 = vmul.f32 %v573_v62, %v1071_v13 }
 0x830   :  { %v575_v0 = vsub.f32 %v567_v60, %v574_v63 }
 0x832   :  { %v576_v1 = vmul.f32 %v575_v0, %v575_v0 }
 0x834   :  { %v577_v2 = vsel %vm110_vm1, %v576_v1, 0.0  ;;  %v719_v1 = vld [vmem:[#allocation5 + $0x88] sm:$0xff] }
 0x835   :  { %578 = vadd.xlane.f32.xlu1 %v577_v2  ;;  %v718_v2 = vld [vmem:[#allocation5 + $0x58] sm:$0xff] }
 0x8a8   :  { %v579_v5 = vpop.xlane.xlu1 %578 }
 0x8a9   :  { %v580_v6 = vmul.f32 %v579_v5, %v1071_v13 }
 0x8ab   :  { %v581_v7 = vadd.f32 1e-05, %v580_v6 }
 0x8ad   :  { %875 = vrsqrt.f32 %v581_v7  ;;  %vm588_vm8 = vweird.f32 %v581_v7 }
 0x8b3   :  { %v876_v8 = vpop.eup %875 }
 0x8b4   :  { %v583_v9 = vmul.f32 %v876_v8, %v581_v7  ;;  %vm589_vm7 = vweird.f32 %v876_v8 }
 0x8b5   :  { %vm590_vm9 = vmor %vm588_vm8, %vm589_vm7 }
 0x8b6   :  { %v584_v10 = vmul.f32 %v876_v8, %v583_v9 }
 0x8b8   :  { %v585_v11 = vmul.f32 0.5, %v584_v10 }
 0x8ba   :  { %v586_v12 = vsub.f32 1.5, %v585_v11 }
 0x8bc   :  { %v587_v14 = vmul.f32 %v876_v8, %v586_v12  ;;  %v851_v12 = vld [vmem:[#allocation8 + $0xc] ss:$0 sm:$0xff] }
 0x8be   :  { %v591_v16 = vsel %vm590_vm9, %v876_v8, %v587_v14 }
 0x8bf   :  { %v592_v18 = vmul.f32 %v591_v16, %v575_v0  ;;  %v720_v0 = vld [vmem:[#allocation5 + $0xb8] sm:$0xff] }
 0x8c0   :  { %738 = vmatpush.msra.mxu0 %v720_v0 }
 0x8c1   :  { %v594_v19 = vmul.f32 %v845_v15, %v592_v18  ;;  %v852_v15 = vld [vmem:[#allocation8 + $0xd] ss:$0 sm:$0xff] }
 0x8c2   :  { %739 = vmatpush.msra.mxu0 %v719_v1 }
 0x8c3   :  { %v596_v20 = vadd.f32 %v846_v17, %v594_v19 }
 0x8c4   :  { %740 = vmatpush.msra.mxu0 %v718_v2 }
 0x8c5   :  { %v597_v21 = vmax.f32 %v596_v20, 0.0  ;;  %v747_v20 = vld [vmem:[#allocation7 + $0x8] sm:$0xff] }
 0x8c6   :  { %741 = vmatpush.msra.mxu0 %v717_v3  ;;  %769 = vmatpush.msra.mxu2 %v747_v20 }
 0x8c7   :  { %v598_v22 = vadd.f32 %v597_v21, %v539_v57  ;;  %v853_v21 = vld [vmem:[#allocation8 + $0xe] ss:$0 sm:$0xff] }
 0x8c9   :  { %813 = vmatmul.msk.f32.vlgmr.msrb.gmra.mxu1 %vm110_vm1, %v598_v22 }
 0x946   :  { %v625_v24 = vpop.f32.mrf.mxu1 }
 0x947   :  { %v626_v25 = vadd.f32 %v847_v23, %v625_v24 }
 0x949   :  { %v630_v26 = vsel %vm110_vm1, %v626_v25, 0.0 }
 0x94a   :  { %631 = vadd.xlane.f32.xlu0 %v630_v26 }
 0x9bd   :  { %v632_v27 = vpop.xlane.xlu0 %631 }
 0x9be   :  { %v633_v28 = vmul.f32 %v632_v27, %v1071_v13 }
 0x9c0   :  { %v634_v29 = vsub.f32 %v626_v25, %v633_v28  ;;  %v854_v25 = vld [vmem:[#allocation8 + $0xf] ss:$0 sm:$0xff] }
 0x9c2   :  { %v635_v30 = vmul.f32 %v634_v29, %v634_v29 }
 0x9c4   :  { %v636_v31 = vsel %vm110_vm1, %v635_v30, 0.0 }
 0x9c5   :  { %637 = vadd.xlane.f32.xlu0 %v636_v31 }
 0xa38   :  { %v638_v36 = vpop.xlane.xlu0 %637 }
 0xa39   :  { %v639_v39 = vmul.f32 %v638_v36, %v1071_v13 }
 0xa3b   :  { %v640_v40 = vadd.f32 1e-05, %v639_v39 }
 0xa3d   :  { %877 = vrsqrt.f32 %v640_v40  ;;  %vm647_vm11 = vweird.f32 %v640_v40 }
 0xa43   :  { %v878_v41 = vpop.eup %877 }
 0xa44   :  { %v642_v42 = vmul.f32 %v878_v41, %v640_v40  ;;  %vm648_vm10 = vweird.f32 %v878_v41 }
 0xa45   :  { %vm649_vm12 = vmor %vm647_vm11, %vm648_vm10 }
 0xa46   :  { %v643_v43 = vmul.f32 %v878_v41, %v642_v42 }
 0xa48   :  { %v644_v44 = vmul.f32 0.5, %v643_v43 }
 0xa4a   :  { %v645_v45 = vsub.f32 1.5, %v644_v44 }
 0xa4c   :  { %v646_v46 = vmul.f32 %v878_v41, %v645_v45 }
 0xa4e   :  { %v650_v48 = vsel %vm649_vm12, %v878_v41, %v646_v46 }
 0xa4f   :  { %v651_v50 = vmul.f32 %v650_v48, %v634_v29 }
 0xa51   :  { %v653_v51 = vmul.f32 %v848_v47, %v651_v50 }
 0xa53   :  { %v655_v52 = vadd.f32 %v849_v49, %v653_v51 }
 0xa55   :  { %v656_v53 = vmax.f32 %v655_v52, 0.0 }
 0xa57   :  { %v657_v54 = vadd.f32 %v656_v53, %v598_v22 }
 0xa59   :  { %814 = vmatmul.msk.f32.vlgmr.msra.gmra.mxu3 %vm110_vm1, %v657_v54 }
 0xadc   :  { %v684_v56 = vpop.f32.mrf.mxu3 }
 0xadd   :  { %v685_v57 = vadd.f32 %v850_v55, %v684_v56 }
 0xadf   :  { %v689_v58 = vsel %vm110_vm1, %v685_v57, 0.0 }
 0xae0   :  { %690 = vadd.xlane.f32.xlu2 %v689_v58 }
 0xb53   :  { %v691_v59 = vpop.xlane.xlu2 %690 }
 0xb54   :  { %v692_v60 = vmul.f32 %v691_v59, %v1071_v13 }
 0xb56   :  { %v693_v61 = vsub.f32 %v685_v57, %v692_v60 }
 0xb58   :  { %v694_v62 = vmul.f32 %v693_v61, %v693_v61 }
 0xb5a   :  { %v695_v63 = vsel %vm110_vm1, %v694_v62, 0.0 }
 0xb5b   :  { %696 = vadd.xlane.f32.xlu0 %v695_v63 }
 0xbce   :  { %v697_v37 = vpop.xlane.xlu0 %696 }
 0xbcf   :  { %v698_v38 = vmul.f32 %v697_v37, %v1071_v13 }
 0xbd1   :  { %v699_v5 = vadd.f32 1e-05, %v698_v38 }
 0xbd3   :  { %879 = vrsqrt.f32 %v699_v5  ;;  %vm706_vm14 = vweird.f32 %v699_v5 }
 0xbd9   :  { %v880_v6 = vpop.eup %879 }
 0xbda   :  { %v701_v7 = vmul.f32 %v880_v6, %v699_v5  ;;  %vm707_vm13 = vweird.f32 %v880_v6 }
 0xbdb   :  { %vm708_vm15 = vmor %vm706_vm14, %vm707_vm13 }
 0xbdc   :  { %v702_v8 = vmul.f32 %v880_v6, %v701_v7 }
 0xbde   :  { %v703_v9 = vmul.f32 0.5, %v702_v8 }
 0xbe0   :  { %v704_v10 = vsub.f32 1.5, %v703_v9 }
 0xbe2   :  { %v705_v11 = vmul.f32 %v880_v6, %v704_v10 }
 0xbe4   :  { %v709_v14 = vsel %vm708_vm15, %v880_v6, %v705_v11 }
 0xbe5   :  { %v710_v16 = vmul.f32 %v709_v14, %v693_v61 }
 0xbe7   :  { %v712_v17 = vmul.f32 %v851_v12, %v710_v16 }
 0xbe9   :  { %v714_v13 = vadd.f32 %v852_v15, %v712_v17 }
 0xbeb   :  { %v715_v18 = vmax.f32 %v714_v13, 0.0 }
 0xbed   :  { %v716_v19 = vadd.f32 %v715_v18, %v657_v54 }
 0xbef   :  { %815 = vmatmul.msk.f32.vlgmr.msra.gmra.mxu0 %vm110_vm1, %v716_v19 }
 0xc6c   :  { %v743_v22 = vpop.f32.mrf.mxu0 }
 0xc6d   :  { %v744_v23 = vadd.f32 %v853_v21, %v743_v22 }
 0xc6f   :  { %v746_v24 = vmax.f32 %v744_v23, 0.0 }
 0xc71   :  { %816 = vmatmul.msk.f32.vlgmr.msra.gmra.mxu2 %vm84_vm0, %v746_v24 }
 0xcf4   :  { %v771_v26 = vpop.f32.mrf.mxu2 }
 0xcf5   :  { %v772_v27 = vadd.f32 %v854_v25, %v771_v26 }
 0xcf7   :  { %774 = vst.msk [vmem:[#allocation10] sm:$0xff] %vm181_vm6, %v772_v27 }
 0xcf8   :  { %785 = dma.vmem_to_hbm [thread:$0]  %s781_s22, 128, %s783_s25, [#allocation4]  }
 0xcf9   :  { %1007 = dma.done.wait [#allocation4], 128  }
 0xcfa   :  { %1008 = vsyncadd [#allocation4], 4294967168 }
 0xcfb   :  { %790 = vsyncpa [#allocation3], 1 }
 0xcfc   :  { %791 = vsyncpa [#allocation6], 1 }
 0xcfd   :  { %792 = vsyncpa [#allocation9], 1 }
 0xcfe   :  { %793 = vsyncpa [#allocation4], 1 }

</bundles_post_ra>
